<compile_context>
chip_gen: v7x
topology: tpu7x:2x2x1
jax: 0.10.0
libtpu: 0.0.40
codegen_flags: <defaults>
</compile_context>

<pallas_src>
import jax
import jax.numpy as jnp
from jax.experimental import pallas as pl
from jax.experimental.pallas import tpu as pltpu

DSZ = 50        # input feature size from the PyTorch module
H = 128         # hidden width
KP = 128        # feature dim zero-padded to a full lane tile / clean MXU K


def _round_up(n, m):
    return ((n + m - 1) // m) * m


def checker_kernel(x_ref, w1_ref, b1_ref, w2_ref, b2_ref, w3_ref, b3_ref, o_ref):
    # Layer 1: Linear(50->128) (+Dropout==identity) + ReLU. bf16 in, f32 accumulate.
    h1 = jnp.dot(x_ref[...], w1_ref[...], preferred_element_type=jnp.float32)
    h1 = jnp.maximum(h1 + b1_ref[...], 0.0)

    # Layer 2: Linear(128->128) (+Dropout==identity) + ReLU.
    h2 = jnp.dot(h1.astype(jnp.bfloat16), w2_ref[...],
                 preferred_element_type=jnp.float32)
    h2 = jnp.maximum(h2 + b2_ref[...], 0.0)

    # Layer 3: Linear(128->1) + sigmoid, computed as (1,H)·(tb,H)^T -> (1,tb).
    # This yields a lane-dense row directly (no N=1 matmul, no (tb,1) column stores).
    logit = jax.lax.dot_general(
        w3_ref[...], h2,
        dimension_numbers=(((1,), (1,)), ((), ())),
        preferred_element_type=jnp.float32,
    ) + b3_ref[0]
    o_ref[...] = jax.nn.sigmoid(logit)


def checker_forward(x, params, *, tb=512):
    """x: [B, DSZ] float32 -> [B, 1] float32 sigmoid probabilities."""
    w1, b1, w2, b2, w3, b3 = params
    B = x.shape[0]

    # Batch tile: multiple of 128 (fills v5e MXU) / 256-friendly for v6e/v7x when
    # B is large; clamped so tiny demo batches don't over-pad.
    tb = max(128, min(tb, _round_up(B, 128)))
    Bp = _round_up(B, tb)
    grid_n = Bp // tb

    # Wrapper-side layout plumbing (outside the kernel):
    #   zero-pad features 50->128, zero-pad batch to a multiple of tb,
    #   cast x / w1 / w2 to bf16 (f32 accumulation in-kernel).
    xp = jnp.zeros((Bp, KP), jnp.bfloat16).at[:B, :DSZ].set(x.astype(jnp.bfloat16))
    w1p = jnp.zeros((KP, H), jnp.bfloat16).at[:DSZ, :].set(w1.astype(jnp.bfloat16))
    w2b = w2.astype(jnp.bfloat16)

    out = pl.pallas_call(
        checker_kernel,
        out_shape=jax.ShapeDtypeStruct((1, Bp), jnp.float32),
        grid_spec=pltpu.PrefetchScalarGridSpec(
            num_scalar_prefetch=0,
            grid=(grid_n,),
            in_specs=[
                pl.BlockSpec((tb, KP), lambda i: (i, 0)),            # x tile (bf16)
                pl.BlockSpec((KP, H), lambda i: (0, 0)),             # w1 (bf16, resident)
                pl.BlockSpec((1, H), lambda i: (0, 0)),              # b1 (f32, resident)
                pl.BlockSpec((H, H), lambda i: (0, 0)),              # w2 (bf16, resident)
                pl.BlockSpec((1, H), lambda i: (0, 0)),              # b2 (f32, resident)
                pl.BlockSpec((1, H), lambda i: (0, 0)),              # w3 row (f32, resident)
                pl.BlockSpec(memory_space=pltpu.MemorySpace.SMEM),   # b3 scalar in SMEM
            ],
            out_specs=pl.BlockSpec((1, tb), lambda i: (0, i)),       # lane-dense output row
        ),
        compiler_params=pltpu.CompilerParams(
            dimension_semantics=("parallel",),
            vmem_limit_bytes=32 * 1024 * 1024,
        ),
    )(xp, w1p, b1, w2b, b2, w3, b3)

    return out.reshape(Bp)[:B].reshape(B, 1)


def init_params(key):
    """PyTorch-style Linear init U(-1/sqrt(fan_in), 1/sqrt(fan_in)).
    Weights stored as [in, out]; w3 stored as a (1, H) row; b3 as (1,)."""
    k = jax.random.split(key, 6)

    def lin(kw, kb, fan_in, fan_out):
        bound = 1.0 / jnp.sqrt(jnp.float32(fan_in))
        w = jax.random.uniform(kw, (fan_in, fan_out), jnp.float32, -bound, bound)
        b = jax.random.uniform(kb, (fan_out,), jnp.float32, -bound, bound)
        return w, b

    w1, b1 = lin(k[0], k[1], DSZ, H)
    w2, b2 = lin(k[2], k[3], H, H)
    w3c, b3 = lin(k[4], k[5], H, 1)                 # (H,1), (1,)
    return (w1, b1.reshape(1, H), w2, b2.reshape(1, H), w3c.reshape(1, H), b3)


def checker_reference(x, params):
    w1, b1, w2, b2, w3, b3 = params
    h1 = jnp.maximum(x @ w1 + b1, 0.0)
    h2 = jnp.maximum(h1 @ w2 + b2, 0.0)
    return jax.nn.sigmoid(h2 @ w3.T + b3)


if __name__ == "__main__":
    key = jax.random.PRNGKey(0)
    k_x, k_p = jax.random.split(key)

    B = 16
    x = jax.random.normal(k_x, (B, DSZ), dtype=jnp.float32)
    params = init_params(k_p)

    out = jax.block_until_ready(checker_forward(x, params))
    ref = checker_reference(x, params)

    assert out.shape == (B, 1)
    assert jnp.allclose(out, ref, atol=2e-2, rtol=0.0), "mismatch vs JAX reference"

    print("KERNEL_OK")
</pallas_src>

<mosaic_0001>
module attributes {stable_mosaic.version = 11 : i64} {
  func.func @checker_kernel(%arg0: i32, %arg1: memref<128x128xbf16, #tpu.memory_space<vmem>>, %arg2: memref<128x128xbf16, #tpu.memory_space<vmem>>, %arg3: memref<1x128xf32, #tpu.memory_space<vmem>>, %arg4: memref<128x128xbf16, #tpu.memory_space<vmem>>, %arg5: memref<1x128xf32, #tpu.memory_space<vmem>>, %arg6: memref<1x128xf32, #tpu.memory_space<vmem>>, %arg7: memref<1xf32, #tpu.memory_space<smem>>, %arg8: memref<1x128xf32, #tpu.memory_space<vmem>>) attributes {dimension_semantics = [#tpu.dimension_semantics<parallel>], iteration_bounds = array<i64: 1>, scalar_prefetch = 0 : i64, scratch_operands = 0 : i64, tpu.core_type = #tpu.core_type<tc>, window_params = [{transform_indices = @transform_0, window_bounds = array<i64: 128, 128>}, {pipeline_mode = #tpu.pipeline_mode<synchronous>, transform_indices = @transform_1, window_bounds = array<i64: 128, 128>}, {pipeline_mode = #tpu.pipeline_mode<synchronous>, transform_indices = @transform_2, window_bounds = array<i64: 1, 128>}, {pipeline_mode = #tpu.pipeline_mode<synchronous>, transform_indices = @transform_3, window_bounds = array<i64: 128, 128>}, {pipeline_mode = #tpu.pipeline_mode<synchronous>, transform_indices = @transform_4, window_bounds = array<i64: 1, 128>}, {pipeline_mode = #tpu.pipeline_mode<synchronous>, transform_indices = @transform_5, window_bounds = array<i64: 1, 128>}, {transform_indices = @transform_6, window_bounds = array<i64: 1>}, {transform_indices = @transform_7, window_bounds = array<i64: 1, 128>}]} {
    %c0 = arith.constant 0 : index
    %c0_0 = arith.constant 0 : index
    %0 = vector.load %arg1[%c0, %c0_0] : memref<128x128xbf16, #tpu.memory_space<vmem>>, vector<128x128xbf16>
    %c0_1 = arith.constant 0 : index
    %c0_2 = arith.constant 0 : index
    %1 = vector.load %arg2[%c0_1, %c0_2] : memref<128x128xbf16, #tpu.memory_space<vmem>>, vector<128x128xbf16>
    %cst = arith.constant dense<0.000000e+00> : vector<128x128xf32>
    %2 = tpu.matmul %0, %1, %cst {dimension_numbers = #tpu.dot_dimension_numbers<[1], [0], [0], [1], [0, 0, 1, 1], [], []>} : vector<128x128xbf16>, vector<128x128xbf16>, vector<128x128xf32> -> vector<128x128xf32>
    %c0_3 = arith.constant 0 : index
    %c0_4 = arith.constant 0 : index
    %3 = vector.load %arg3[%c0_3, %c0_4] : memref<1x128xf32, #tpu.memory_space<vmem>>, vector<1x128xf32>
    %4 = vector.broadcast %3 : vector<1x128xf32> to vector<128x128xf32>
    %5 = arith.addf %2, %4 : vector<128x128xf32>
    %cst_5 = arith.constant 0.000000e+00 : f32
    %6 = vector.broadcast %cst_5 : f32 to vector<128x128xf32>
    %7 = arith.maximumf %5, %6 : vector<128x128xf32>
    %8 = arith.truncf %7 : vector<128x128xf32> to vector<128x128xbf16>
    %c0_6 = arith.constant 0 : index
    %c0_7 = arith.constant 0 : index
    %9 = vector.load %arg4[%c0_6, %c0_7] : memref<128x128xbf16, #tpu.memory_space<vmem>>, vector<128x128xbf16>
    %cst_8 = arith.constant dense<0.000000e+00> : vector<128x128xf32>
    %10 = tpu.matmul %8, %9, %cst_8 {dimension_numbers = #tpu.dot_dimension_numbers<[1], [0], [0], [1], [0, 0, 1, 1], [], []>} : vector<128x128xbf16>, vector<128x128xbf16>, vector<128x128xf32> -> vector<128x128xf32>
    %c0_9 = arith.constant 0 : index
    %c0_10 = arith.constant 0 : index
    %11 = vector.load %arg5[%c0_9, %c0_10] : memref<1x128xf32, #tpu.memory_space<vmem>>, vector<1x128xf32>
    %12 = vector.broadcast %11 : vector<1x128xf32> to vector<128x128xf32>
    %13 = arith.addf %10, %12 : vector<128x128xf32>
    %cst_11 = arith.constant 0.000000e+00 : f32
    %14 = vector.broadcast %cst_11 : f32 to vector<128x128xf32>
    %15 = arith.maximumf %13, %14 : vector<128x128xf32>
    %c0_12 = arith.constant 0 : index
    %c0_13 = arith.constant 0 : index
    %16 = vector.load %arg6[%c0_12, %c0_13] : memref<1x128xf32, #tpu.memory_space<vmem>>, vector<1x128xf32>
    %cst_14 = arith.constant dense<0.000000e+00> : vector<1x128xf32>
    %17 = tpu.matmul %16, %15, %cst_14 {dimension_numbers = #tpu.dot_dimension_numbers<[1], [1], [0], [0], [0, 0, 1, 0], [], []>} : vector<1x128xf32>, vector<128x128xf32>, vector<1x128xf32> -> vector<1x128xf32>
    %c0_15 = arith.constant 0 : index
    %18 = memref.load %arg7[%c0_15] : memref<1xf32, #tpu.memory_space<smem>>
    %19 = vector.broadcast %18 : f32 to vector<1x128xf32>
    %20 = arith.addf %17, %19 : vector<1x128xf32>
    %21 = arith.negf %20 : vector<1x128xf32>
    %22 = math.exp %21 : vector<1x128xf32>
    %cst_16 = arith.constant 1.000000e+00 : f32
    %23 = vector.broadcast %cst_16 : f32 to vector<1x128xf32>
    %24 = arith.addf %23, %22 : vector<1x128xf32>
    %25 = arith.divf %23, %24 : vector<1x128xf32>
    %c0_17 = arith.constant 0 : index
    %c0_18 = arith.constant 0 : index
    %26 = vector.load %arg8[%c0_17, %c0_18] : memref<1x128xf32, #tpu.memory_space<vmem>>, vector<1x128xf32>
    tpu.vector_store %arg8[%c0_17, %c0_18], %25 {strides = array<i32>} : memref<1x128xf32, #tpu.memory_space<vmem>>, vector<1x128xf32>,
    return
  }
  func.func @transform_0(%arg0: i32) -> (i32, i32) {
    %c0_i32 = arith.constant 0 : i32
    %c0_i32_0 = arith.constant 0 : i32
    return %arg0, %c0_i32 : i32, i32
  }
  func.func @transform_1(%arg0: i32) -> (i32, i32) {
    %c0_i32 = arith.constant 0 : i32
    %c0_i32_0 = arith.constant 0 : i32
    %c0_i32_1 = arith.constant 0 : i32
    return %c0_i32, %c0_i32_0 : i32, i32
  }
  func.func @transform_2(%arg0: i32) -> (i32, i32) {
    %c0_i32 = arith.constant 0 : i32
    %c0_i32_0 = arith.constant 0 : i32
    %c0_i32_1 = arith.constant 0 : i32
    return %c0_i32, %c0_i32_0 : i32, i32
  }
  func.func @transform_3(%arg0: i32) -> (i32, i32) {
    %c0_i32 = arith.constant 0 : i32
    %c0_i32_0 = arith.constant 0 : i32
    %c0_i32_1 = arith.constant 0 : i32
    return %c0_i32, %c0_i32_0 : i32, i32
  }
  func.func @transform_4(%arg0: i32) -> (i32, i32) {
    %c0_i32 = arith.constant 0 : i32
    %c0_i32_0 = arith.constant 0 : i32
    %c0_i32_1 = arith.constant 0 : i32
    return %c0_i32, %c0_i32_0 : i32, i32
  }
  func.func @transform_5(%arg0: i32) -> (i32, i32) {
    %c0_i32 = arith.constant 0 : i32
    %c0_i32_0 = arith.constant 0 : i32
    %c0_i32_1 = arith.constant 0 : i32
    return %c0_i32, %c0_i32_0 : i32, i32
  }
  func.func @transform_6(%arg0: i32) -> i32 {
    %c0_i32 = arith.constant 0 : i32
    %c0_i32_0 = arith.constant 0 : i32
    return %c0_i32 : i32
  }
  func.func @transform_7(%arg0: i32) -> (i32, i32) {
    %c0_i32 = arith.constant 0 : i32
    %c0_i32_0 = arith.constant 0 : i32
    return %c0_i32, %arg0 : i32, i32
  }
}

</mosaic_0001>

<bundles_post_ra>
// kernel: tpu_custom_call.1
= control target key start
LH: loop header
LB: loop body
LE: loop exit
PB: predicated region body
PF: predicated region fallthrough
CT: control target
= control target key end

     0   :  { %13 = vsyncpa [#allocation4], 0  ;;  %s1069_s0 = inlined_call_operand.hbm [shape: bf16[128,128], index: 0, kind: input, shape index: {}]   ;;  %s1070_s1 = inlined_call_operand.hbm [shape: bf16[128,128], index: 1, kind: input, shape index: {}]   ;;  %s1071_s2 = inlined_call_operand.vmem [shape: f32[1,128], index: 2, kind: input, shape index: {}]   ;;  %s1072_s3 = inlined_call_operand.hbm [shape: bf16[128,128], index: 3, kind: input, shape index: {}]   ;;  %s1073_s4 = inlined_call_operand.vmem [shape: f32[1,128], index: 4, kind: input, shape index: {}]   ;;  %s1074_s5 = inlined_call_operand.vmem [shape: f32[1,128], index: 5, kind: input, shape index: {}]   ;;  %s1075_s6 = inlined_call_operand.<no memory space> [shape: f32[1], index: 6, kind: input, shape index: {}]   ;;  %s1076_s7 = inlined_call_operand.hbm [shape: f32[1,128], index: 7, kind: output, shape index: {}]  }
   0x1   :  { %14 = vsyncpa [#allocation7], 0 }
   0x2   :  { %15 = vsyncpa [#allocation5], 0  ;;  %s936_s24 = smov [#allocation6]   ;;  %s937_s26 = smov [#allocation3]  }
   0x3   :  { %s33_s25 = sshll.u32 %s936_s24, 4  ;;  %s21_s27 = sshll.u32 %s937_s26, 4  ;;  %s34_s25 = int_to_ptr.vmem [resolvable:$true] %s33_s25  ;;  %s985_s27 = int_to_ptr.vmem [resolvable:$true] %s21_s27 }
   0x4   :  { %s842_s30 = scalar_lea.hbm %s1070_s1, 1024 }
   0x5   :  { %p843_p0 = scmp.ne.s32.totalorder %s1070_s1, %s842_s30  ;;  %p846_p1 = scmp.lt.u32.totalorder %s842_s30, %s1070_s1 }
   0x7   :  { %p848_p2 = pnand %p846_p1, %p843_p0 }
   0x9   :  { %851 = shalt.err (!%p848_p2)
}
   0xa   :  { %s852_s12 = scalar_lea.vmem %s34_s25, 1024  ;;  %p857_p4 = scmp.lt.s32.totalorder %s34_s25, %s34_s25 }
   0xb   :  { %p853_p3 = scmp.ne.s32.totalorder %s34_s25, %s852_s12  ;;  %p858_p5 = scmp.lt.s32.totalorder %s852_s12, %s852_s12 }
   0xd   :  { %p859_p6 = por %p858_p5, %p857_p4 }
   0xf   :  { %p860_p7 = pnand %p859_p6, %p853_p3 }
  0x11   :  { %863 = shalt.err (!%p860_p7)
}
  0x12   :  { %s938_s13 = smov 64   ;;  %s939_s14 = smov 4  }
  0x13   :  { %39 = dma.hbm_to_vmem [thread:$0]  %s1070_s1, 1024, %s34_s25, [#allocation7], %s938_s13, %s938_s13, %s939_s14  }
  0x14   :  { %s864_s19 = scalar_lea.hbm %s1069_s0, 1024 }
  0x15   :  { %p865_p8 = scmp.ne.s32.totalorder %s1069_s0, %s864_s19  ;;  %p868_p9 = scmp.lt.u32.totalorder %s864_s19, %s1069_s0 }
  0x17   :  { %p870_p10 = pnand %p868_p9, %p865_p8 }
  0x19   :  { %873 = shalt.err (!%p870_p10)
}
  0x1a   :  { %s874_s24 = scalar_lea.vmem %s985_s27, 1024  ;;  %p879_p12 = scmp.lt.s32.totalorder %s985_s27, %s985_s27 }
  0x1b   :  { %p875_p11 = scmp.ne.s32.totalorder %s985_s27, %s874_s24  ;;  %p880_p13 = scmp.lt.s32.totalorder %s874_s24, %s874_s24 }
  0x1d   :  { %p881_p0 = por %p880_p13, %p879_p12 }
  0x1f   :  { %p882_p1 = pnand %p881_p0, %p875_p11 }
  0x21   :  { %885 = shalt.err (!%p882_p1)
}
  0x22   :  { %27 = dma.hbm_to_vmem [thread:$0]  %s1069_s0, 1024, %s985_s27, [#allocation4], %s938_s13, %s938_s13, %s939_s14  }
  0x23   :  { %s940_s26 = smov [#allocation8]   ;;  %s886_s8 = scalar_lea.hbm %s1072_s3, 1024 }
  0x24   :  { %s47_s28 = sshll.u32 %s940_s26, 4  ;;  %p887_p2 = scmp.ne.s32.totalorder %s1072_s3, %s886_s8  ;;  %s48_s28 = int_to_ptr.vmem [resolvable:$true] %s47_s28 }
  0x25   :  { %p890_p3 = scmp.lt.u32.totalorder %s886_s8, %s1072_s3 }
  0x27   :  { %p892_p4 = pnand %p890_p3, %p887_p2 }
  0x29   :  { %895 = shalt.err (!%p892_p4)
}
  0x2a   :  { %s896_s15 = scalar_lea.vmem %s48_s28, 1024  ;;  %p901_p6 = scmp.lt.s32.totalorder %s48_s28, %s48_s28 }
  0x2b   :  { %p897_p5 = scmp.ne.s32.totalorder %s48_s28, %s896_s15  ;;  %p902_p7 = scmp.lt.s32.totalorder %s896_s15, %s896_s15 }
  0x2d   :  { %p903_p8 = por %p902_p7, %p901_p6 }
  0x2f   :  { %p904_p9 = pnand %p903_p8, %p897_p5 }
  0x31   :  { %907 = shalt.err (!%p904_p9)
}
  0x32   :  { %53 = dma.hbm_to_vmem [thread:$0]  %s1072_s3, 1024, %s48_s28, [#allocation7], %s938_s13, %s938_s13, %s939_s14  }
  0x33   :  { %930 = dma.done.wait [#allocation4], 1024  }
  0x34   :  { %931 = vsyncadd [#allocation4], 4294966272 }
  0x35   :  { %932 = dma.done.wait [#allocation7], 2048  }
  0x36   :  { %933 = vsyncadd [#allocation7], 4294965248  ;;  %v814_v0 = vld [vmem:[#allocation6] sm:$0xff]   ;;  %v815_v1 = vld [vmem:[#allocation6 + $0x8] sm:$0xff]   ;;  %vm942_vm0 = vmmov 0   ;;  %s944_s19 = smov [#allocation9]  }
  0x37   :  { %682 = vmatprep.subr.bf16.mxu1 %v814_v0  ;;  %v816_v2 = vld [vmem:[#allocation6 + $0x10] sm:$0xff]   ;;  %v817_v3 = vld [vmem:[#allocation6 + $0x18] sm:$0xff]   ;;  %v822_v4 = vld [vmem:[#allocation3] sm:$0xff]   ;;  %s596_s20 = sshll.u32 %s944_s19, 4  ;;  %s597_s20 = int_to_ptr.vmem [resolvable:$true] %s596_s20 }
  0x38   :  { %683 = vmatpush3.bf16.msra.mxu1 %v814_v0  ;;  %698 = vmatprep.mubr.bf16.mxu1 %v822_v4  ;;  %v818_v5 = vld [vmem:[#allocation6 + $0x20] sm:$0xff]   ;;  %v819_v6 = vld [vmem:[#allocation6 + $0x28] sm:$0xff]   ;;  %v820_v7 = vld [vmem:[#allocation6 + $0x30] sm:$0xff]   ;;  %s908_s21 = scalar_lea.vmem %s597_s20, 16  ;;  %p913_p11 = scmp.lt.s32.totalorder %s597_s20, %s597_s20 }
  0x39   :  { %684 = vmatprep.subr.bf16.mxu1 %v815_v1  ;;  %v821_v8 = vld [vmem:[#allocation6 + $0x38] sm:$0xff]   ;;  %v830_v9 = vld [vmem:[#allocation8] sm:$0xff]   ;;  %v823_v10 = vld [vmem:[#allocation3 + $0x8] sm:$0xff]   ;;  %p909_p10 = scmp.ne.s32.totalorder %s597_s20, %s908_s21 }
  0x3a   :  { %v824_v11 = vld [vmem:[#allocation3 + $0x10] sm:$0xff]   ;;  %v831_v12 = vld [vmem:[#allocation8 + $0x8] sm:$0xff]   ;;  %v825_v14 = vld [vmem:[#allocation3 + $0x18] sm:$0xff]  }
  0x3b   :  { %v832_v13 = vld [vmem:[#allocation8 + $0x10] sm:$0xff]   ;;  %v826_v15 = vld [vmem:[#allocation3 + $0x20] sm:$0xff]   ;;  %v833_v16 = vld [vmem:[#allocation8 + $0x18] sm:$0xff]  }
  0x3c   :  { %685 = vmatpush3.bf16.msra.mxu1 %v815_v1  ;;  %v834_v17 = vld [vmem:[#allocation8 + $0x20] sm:$0xff]   ;;  %v827_v18 = vld [vmem:[#allocation3 + $0x28] sm:$0xff]   ;;  %v828_v19 = vld [vmem:[#allocation3 + $0x30] sm:$0xff]  }
  0x3d   :  { %686 = vmatprep.subr.bf16.mxu1 %v816_v2  ;;  %v835_v20 = vld [vmem:[#allocation8 + $0x28] sm:$0xff]   ;;  %v829_v21 = vld [vmem:[#allocation3 + $0x38] sm:$0xff]   ;;  %v836_v22 = vld [vmem:[#allocation8 + $0x30] sm:$0xff]  }
  0x3e   :  { %v837_v23 = vld [vmem:[#allocation8 + $0x38] sm:$0xff]   ;;  %v606_v24 = vld [vmem:[%s1071_s2] ss:$0 sm:$0xff] }
  0x40   :  { %687 = vmatpush3.bf16.msra.mxu1 %v816_v2 }
  0x41   :  { %688 = vmatprep.subr.bf16.mxu1 %v817_v3 }
  0x44   :  { %689 = vmatpush3.bf16.msra.mxu1 %v817_v3 }
  0x45   :  { %690 = vmatprep.subr.bf16.mxu1 %v818_v5 }
  0x48   :  { %691 = vmatpush3.bf16.msra.mxu1 %v818_v5 }
  0x49   :  { %692 = vmatprep.subr.bf16.mxu1 %v819_v6 }
  0x4c   :  { %693 = vmatpush3.bf16.msra.mxu1 %v819_v6 }
  0x4d   :  { %694 = vmatprep.subr.bf16.mxu1 %v820_v7 }
  0x50   :  { %695 = vmatpush3.bf16.msra.mxu1 %v820_v7 }
  0x51   :  { %696 = vmatprep.subr.bf16.mxu1 %v821_v8 }
  0x54   :  { %697 = vmatpush3.bf16.msra.mxu1 %v821_v8 }
  0x55   :  { %714 = vmatprep.subr.bf16.mxu1 %v830_v9 }
  0x57   :  { %699 = vmatmul.mubr.bf16.vlgmr.msra.gmra.mrb[0].mxu1 %v823_v10 }
  0x58   :  { %702 = vmatprep.mubr.bf16.mxu1 %v824_v11  ;;  %715 = vmatpush3.bf16.msra.mxu1 %v830_v9 }
  0x59   :  { %716 = vmatprep.subr.bf16.mxu1 %v831_v12 }
  0x5c   :  { %717 = vmatpush3.bf16.msra.mxu1 %v831_v12 }
  0x5d   :  { %718 = vmatprep.subr.bf16.mxu1 %v832_v13 }
  0x5f   :  { %703 = vmatmul.mubr.bf16.gmra.mrb[4].mxu1 %v825_v14 }
  0x60   :  { %706 = vmatprep.mubr.bf16.mxu1 %v826_v15  ;;  %719 = vmatpush3.bf16.msra.mxu1 %v832_v13 }
  0x61   :  { %720 = vmatprep.subr.bf16.mxu1 %v833_v16 }
  0x64   :  { %721 = vmatpush3.bf16.msra.mxu1 %v833_v16 }
  0x65   :  { %722 = vmatprep.subr.bf16.mxu1 %v834_v17 }
  0x67   :  { %707 = vmatmul.mubr.bf16.gmra.mrb[8].mxu1 %v827_v18  ;;  %v943_v18 = vmov 0.0  }
  0x68   :  { %710 = vmatprep.mubr.bf16.mxu1 %v828_v19  ;;  %723 = vmatpush3.bf16.msra.mxu1 %v834_v17  ;;  %v941_v17 = vmov 0.0|0.0   ;;  %v623_v19 = vld [vmem:[%s1073_s4] ss:$0 sm:$0xff] }
  0x69   :  { %724 = vmatprep.subr.bf16.mxu1 %v835_v20  ;;  %781 = vmatprep.subr.bf16.mxu0 %v941_v17 }
  0x6a   :  { %778 = vmatprep.mubr.msk.f32.mxu0 %vm942_vm0, %v943_v18 }
  0x6c   :  { %725 = vmatpush3.bf16.msra.mxu1 %v835_v20 }
  0x6d   :  { %726 = vmatprep.subr.bf16.mxu1 %v836_v22 }
  0x6f   :  { %711 = vmatmul.mubr.bf16.gmra.mrb[12].mxu1 %v829_v21 }
  0x70   :  { %727 = vmatpush3.bf16.msra.mxu1 %v836_v22 }
  0x71   :  { %728 = vmatprep.subr.bf16.mxu1 %v837_v23 }
  0x74   :  { %729 = vmatpush3.bf16.msra.mxu1 %v837_v23 }
 0x12a   :  { %v700_v25 = vpop.f32.mrb[0].mxu1 }
 0x12b   :  { %v248_v26 = vadd.f32 %v700_v25, %v606_v24  ;;  %v239_v27 = vpop.f32.mrb[1].mxu1 }
 0x12c   :  { %v240_v28 = vadd.f32 %v606_v24, %v239_v27  ;;  %v701_v29 = vpop.f32.mrb[2].mxu1 }
 0x12d   :  { %v251_v30 = vadd.f32 %v701_v29, %v606_v24  ;;  %v242_v31 = vpop.f32.mrb[3].mxu1  ;;  %v304_v33 = vmax.f32 %v248_v26, 0.0 }
 0x12e   :  { %v243_v32 = vadd.f32 %v606_v24, %v242_v31  ;;  %v302_v35 = vmax.f32 %v240_v28, 0.0 }
 0x12f   :  { %v305_v34 = vmax.f32 %v251_v30, 0.0 }
 0x130   :  { %v303_v36 = vmax.f32 %v243_v32, 0.0 }
 0x131   :  { %v319_v37 = vpack.c.bf16 %v305_v34, %v304_v33 }
 0x132   :  { %v318_v38 = vpack.c.bf16 %v303_v36, %v302_v35  ;;  %v704_v39 = vpop.f32.mrb[4].mxu1 }
 0x133   :  { %v264_v40 = vadd.f32 %v704_v39, %v606_v24  ;;  %v255_v41 = vpop.f32.mrb[5].mxu1 }
 0x134   :  { %v256_v42 = vadd.f32 %v606_v24, %v255_v41  ;;  %730 = vmatprep.mubr.bf16.mxu1 %v318_v38  ;;  %v705_v43 = vpop.f32.mrb[6].mxu1 }
 0x135   :  { %v308_v44 = vmax.f32 %v264_v40, 0.0  ;;  %v267_v45 = vadd.f32 %v705_v43, %v606_v24  ;;  %731 = vmatmul.mubr.bf16.vlgmr.msra.gmra.mrb[16].mxu1 %v319_v37  ;;  %v258_v46 = vpop.f32.mrb[7].mxu1 }
 0x136   :  { %v306_v47 = vmax.f32 %v256_v42, 0.0  ;;  %v259_v48 = vadd.f32 %v606_v24, %v258_v46 }
 0x137   :  { %v309_v49 = vmax.f32 %v267_v45, 0.0 }
 0x138   :  { %v307_v50 = vmax.f32 %v259_v48, 0.0 }
 0x139   :  { %v321_v51 = vpack.c.bf16 %v309_v49, %v308_v44 }
 0x13a   :  { %v320_v52 = vpack.c.bf16 %v307_v50, %v306_v47  ;;  %v708_v53 = vpop.f32.mrb[8].mxu1 }
 0x13b   :  { %v280_v54 = vadd.f32 %v708_v53, %v606_v24  ;;  %v271_v55 = vpop.f32.mrb[9].mxu1 }
 0x13c   :  { %734 = vmatprep.mubr.bf16.mxu1 %v320_v52  ;;  %v272_v56 = vadd.f32 %v606_v24, %v271_v55  ;;  %v709_v57 = vpop.f32.mrb[10].mxu1 }
 0x13d   :  { %735 = vmatmul.mubr.bf16.gmra.mrb[20].mxu1 %v321_v51  ;;  %v312_v58 = vmax.f32 %v280_v54, 0.0  ;;  %v283_v59 = vadd.f32 %v709_v57, %v606_v24  ;;  %v274_v60 = vpop.f32.mrb[11].mxu1 }
 0x13e   :  { %v310_v61 = vmax.f32 %v272_v56, 0.0  ;;  %v275_v62 = vadd.f32 %v606_v24, %v274_v60 }
 0x13f   :  { %v313_v63 = vmax.f32 %v283_v59, 0.0 }
 0x140   :  { %v311_v0 = vmax.f32 %v275_v62, 0.0 }
 0x141   :  { %v323_v1 = vpack.c.bf16 %v313_v63, %v312_v58 }
 0x142   :  { %v322_v2 = vpack.c.bf16 %v311_v0, %v310_v61  ;;  %v712_v3 = vpop.f32.mrb[12].mxu1 }
 0x143   :  { %v296_v4 = vadd.f32 %v712_v3, %v606_v24  ;;  %v287_v5 = vpop.f32.mrb[13].mxu1 }
 0x144   :  { %738 = vmatprep.mubr.bf16.mxu1 %v322_v2  ;;  %v288_v6 = vadd.f32 %v606_v24, %v287_v5  ;;  %v713_v7 = vpop.f32.mrb[14].mxu1 }
 0x145   :  { %739 = vmatmul.mubr.bf16.gmra.mrb[24].mxu1 %v323_v1  ;;  %v316_v8 = vmax.f32 %v296_v4, 0.0  ;;  %v299_v9 = vadd.f32 %v713_v7, %v606_v24  ;;  %v290_v10 = vpop.f32.mrb[15].mxu1 }
 0x146   :  { %v314_v11 = vmax.f32 %v288_v6, 0.0  ;;  %v291_v12 = vadd.f32 %v606_v24, %v290_v10 }
 0x147   :  { %v317_v13 = vmax.f32 %v299_v9, 0.0 }
 0x148   :  { %v315_v14 = vmax.f32 %v291_v12, 0.0  ;;  %v510_v12 = vld [vmem:[%s1074_s5] sm:$0x1]  ;;  %s912_s5 = scalar_lea.vmem %s597_s20, 32 }
 0x149   :  { %v325_v15 = vpack.c.bf16 %v317_v13, %v316_v8  ;;  %v512_v13 = vstv %s1075_s6  ;;  %p914_p12 = scmp.lt.s32.totalorder %s912_s5, %s908_s21 }
 0x14a   :  { %v324_v16 = vpack.c.bf16 %v315_v14, %v314_v11 }
 0x14b   :  { %p915_p13 = por %p914_p12, %p913_p11 }
 0x14c   :  { %742 = vmatprep.mubr.bf16.mxu1 %v324_v16 }
 0x14d   :  { %743 = vmatmul.mubr.bf16.gmra.mrb[28].mxu1 %v325_v15  ;;  %p916_p0 = pnand %p915_p13, %p909_p10 }
 0x208   :  { %v732_v20 = vpop.f32.mrb[16].mxu1 }
 0x209   :  { %v440_v21 = vadd.f32 %v732_v20, %v623_v19  ;;  %v431_v22 = vpop.f32.mrb[17].mxu1 }
 0x20a   :  { %v432_v23 = vadd.f32 %v623_v19, %v431_v22  ;;  %v733_v24 = vpop.f32.mrb[18].mxu1 }
 0x20b   :  { %v443_v25 = vadd.f32 %v733_v24, %v623_v19  ;;  %v434_v26 = vpop.f32.mrb[19].mxu1  ;;  %v496_v28 = vmax.f32 %v440_v21, 0.0 }
 0x20c   :  { %v435_v27 = vadd.f32 %v623_v19, %v434_v26  ;;  %v494_v30 = vmax.f32 %v432_v23, 0.0 }
 0x20d   :  { %v497_v29 = vmax.f32 %v443_v25, 0.0 }
 0x20e   :  { %v495_v31 = vmax.f32 %v435_v27, 0.0 }
 0x20f   :  { %v785_v32 = vpack.c.bf16 %v497_v29, %v496_v28 }
 0x210   :  { %v736_v33 = vpop.f32.mrb[20].mxu1  ;;  %v782_v34 = vpack.c.bf16 %v495_v31, %v494_v30 }
 0x211   :  { %v456_v35 = vadd.f32 %v736_v33, %v623_v19  ;;  %v447_v36 = vpop.f32.mrb[21].mxu1 }
 0x212   :  { %v448_v37 = vadd.f32 %v623_v19, %v447_v36  ;;  %783 = vmatpush3.bf16.xpose.msra.mxu0 %v782_v34  ;;  %v737_v38 = vpop.f32.mrb[22].mxu1 }
 0x213   :  { %v500_v39 = vmax.f32 %v456_v35, 0.0  ;;  %v459_v40 = vadd.f32 %v737_v38, %v623_v19  ;;  %v450_v41 = vpop.f32.mrb[23].mxu1  ;;  %784 = vmatprep.subr.bf16.mxu0 %v941_v17 }
 0x214   :  { %v498_v42 = vmax.f32 %v448_v37, 0.0  ;;  %v451_v43 = vadd.f32 %v623_v19, %v450_v41 }
 0x215   :  { %v501_v44 = vmax.f32 %v459_v40, 0.0 }
 0x216   :  { %v499_v45 = vmax.f32 %v451_v43, 0.0 }
 0x217   :  { %v791_v46 = vpack.c.bf16 %v501_v44, %v500_v39 }
 0x218   :  { %v788_v47 = vpack.c.bf16 %v499_v45, %v498_v42  ;;  %v740_v48 = vpop.f32.mrb[24].mxu1 }
 0x219   :  { %v472_v49 = vadd.f32 %v740_v48, %v623_v19  ;;  %v463_v50 = vpop.f32.mrb[25].mxu1 }
 0x21a   :  { %786 = vmatpush3.bf16.xpose.msra.mxu0 %v785_v32  ;;  %v464_v51 = vadd.f32 %v623_v19, %v463_v50  ;;  %v741_v52 = vpop.f32.mrb[26].mxu1 }
 0x21b   :  { %v504_v53 = vmax.f32 %v472_v49, 0.0  ;;  %787 = vmatprep.subr.bf16.mxu0 %v941_v17  ;;  %v475_v54 = vadd.f32 %v741_v52, %v623_v19  ;;  %v466_v55 = vpop.f32.mrb[27].mxu1 }
 0x21c   :  { %v502_v56 = vmax.f32 %v464_v51, 0.0  ;;  %v467_v57 = vadd.f32 %v623_v19, %v466_v55 }
 0x21d   :  { %v505_v58 = vmax.f32 %v475_v54, 0.0 }
 0x21e   :  { %v503_v59 = vmax.f32 %v467_v57, 0.0 }
 0x21f   :  { %v797_v60 = vpack.c.bf16 %v505_v58, %v504_v53 }
 0x220   :  { %v794_v61 = vpack.c.bf16 %v503_v59, %v502_v56  ;;  %v744_v62 = vpop.f32.mrb[28].mxu1 }
 0x221   :  { %v488_v63 = vadd.f32 %v744_v62, %v623_v19  ;;  %v479_v0 = vpop.f32.mrb[29].mxu1 }
 0x222   :  { %789 = vmatpush3.bf16.xpose.msra.mxu0 %v788_v47  ;;  %v480_v1 = vadd.f32 %v623_v19, %v479_v0  ;;  %v745_v2 = vpop.f32.mrb[30].mxu1 }
 0x223   :  { %790 = vmatprep.subr.bf16.mxu0 %v941_v17  ;;  %v508_v3 = vmax.f32 %v488_v63, 0.0  ;;  %v491_v4 = vadd.f32 %v745_v2, %v623_v19  ;;  %v482_v5 = vpop.f32.mrb[31].mxu1 }
 0x224   :  { %v506_v6 = vmax.f32 %v480_v1, 0.0  ;;  %v483_v7 = vadd.f32 %v623_v19, %v482_v5 }
 0x225   :  { %v509_v8 = vmax.f32 %v491_v4, 0.0 }
 0x226   :  { %v507_v9 = vmax.f32 %v483_v7, 0.0 }
 0x227   :  { %v803_v10 = vpack.c.bf16 %v509_v8, %v508_v3 }
 0x228   :  { %v800_v11 = vpack.c.bf16 %v507_v9, %v506_v6 }
 0x22a   :  { %792 = vmatpush3.bf16.xpose.msra.mxu0 %v791_v46 }
 0x22b   :  { %793 = vmatprep.subr.bf16.mxu0 %v941_v17 }
 0x232   :  { %795 = vmatpush3.bf16.xpose.msra.mxu0 %v794_v61 }
 0x233   :  { %796 = vmatprep.subr.bf16.mxu0 %v941_v17 }
 0x23a   :  { %798 = vmatpush3.bf16.xpose.msra.mxu0 %v797_v60 }
 0x23b   :  { %799 = vmatprep.subr.bf16.mxu0 %v941_v17 }
 0x242   :  { %801 = vmatpush3.bf16.xpose.msra.mxu0 %v800_v11 }
 0x243   :  { %802 = vmatprep.subr.bf16.mxu0 %v941_v17 }
 0x24a   :  { %804 = vmatpush3.bf16.xpose.msra.mxu0 %v803_v10 }
 0x251   :  { %779 = vmatmul.mubr.f32.vlgmr.msra.gmra.mrb[0].mxu0 %v510_v12 }
 0x324   :  { %v579_v14 = vpop.f32.mrb[0].mxu0 }
 0x325   :  { %v580_v15 = vadd.f32 %v579_v14, %v512_v13  ;;  %v780_v16 = vpop.f32.mrb[1].mxu0 }
 0x327   :  { %v632_v18 = vmul.f32 -1.442695, %v580_v15 }
 0x329   :  { %838 = vpow2.f32 %v632_v18 }
 0x333   :  { %v839_v19 = vpop.eup %838 }
 0x334   :  { %v586_v20 = vadd.f32 1.0, %v839_v19 }
 0x336   :  { %840 = vrcp.f32 %v586_v20 }
 0x340   :  { %v841_v17 = vpop.eup %840 }
 0x341   :  { %589 = vst [vmem:[#allocation9] sm:$0x1] %v841_v17 }
 0x342   :  { %919 = shalt.err (!%p916_p0)
}
 0x343   :  { %s920_s23 = scalar_lea.hbm %s1076_s7, 16 }
 0x344   :  { %p921_p1 = scmp.ne.s32.totalorder %s1076_s7, %s920_s23  ;;  %p924_p2 = scmp.lt.u32.totalorder %s920_s23, %s1076_s7 }
 0x346   :  { %p926_p3 = pnand %p924_p2, %p921_p1 }
 0x348   :  { %929 = shalt.err (!%p926_p3)
}
 0x349   :  { %599 = dma.vmem_to_hbm [thread:$0]  %s597_s20, 16, %s1076_s7, [#allocation5]  }
 0x34a   :  { %934 = dma.done.wait [#allocation5], 16  }
 0x34b   :  { %935 = vsyncadd [#allocation5], 4294967280 }
 0x34c   :  { %603 = vsyncpa [#allocation4], 1 }
 0x34d   :  { %604 = vsyncpa [#allocation7], 1 }
 0x34e   :  { %605 = vsyncpa [#allocation5], 1 }

</bundles_post_ra>
